<compile_context>
chip_gen: v7x
topology: tpu7x:2x2x1
jax: 0.10.0
libtpu: 0.0.40
codegen_flags: <defaults>
</compile_context>

<pallas_src>
import jax
import jax.numpy as jnp
from jax.experimental import pallas as pl
from jax.experimental.pallas import tpu as pltpu


def build_adjacency_matrix(num_verts: int, faces: jnp.ndarray) -> jnp.ndarray:
    """Dense equivalent of the torch sparse adjacency (duplicate edges accumulate)."""
    faces = faces.astype(jnp.int32)
    row = jnp.concatenate(
        [faces[:, 0], faces[:, 1], faces[:, 2], faces[:, 1], faces[:, 2], faces[:, 0]]
    )
    col = jnp.concatenate(
        [faces[:, 1], faces[:, 2], faces[:, 0], faces[:, 0], faces[:, 1], faces[:, 2]]
    )
    adj = jnp.zeros((num_verts, num_verts), jnp.float32).at[row, col].add(1.0)
    adj = adj + jnp.eye(num_verts, dtype=jnp.float32)
    # Note: bf16 downstream is exact only while per-entry edge multiplicity
    # (+1 diagonal) stays <= 256 -- always true for triangle meshes.
    return adj  # symmetric by construction


def _pick_tile(extent: int, target: int) -> int:
    """Largest multiple of 128 that is <= target and divides extent."""
    t = min(target, extent)
    t -= t % 128
    while t > 128 and extent % t:
        t -= 128
    return max(t, 128)


def _vmem_cap_bytes() -> int:
    """~3/4 of physical VMEM: ~48 MiB on 64 MiB (v7x), ~96 MiB on 128 MiB parts."""
    try:
        cap = int(pltpu.get_tpu_info().vmem_capacity_bytes)
    except Exception:
        cap = 64 << 20
    return max((cap * 3) // 4, 16 << 20)


def _propagate_kernel(pc_ref, adj_ref, prop_ref):
    """One (j, k) step: prop[:, j-tile] += pc_lhs[:, k-tile] @ A[k-tile, j-tile].

    pc_ref:   (B+1, TK) bf16  -- sigmoid(pred) rows + one all-ones row (degree fold)
    adj_ref:  (TK, TN)  bf16  -- streamed adjacency tile (native MXU bf16 path)
    prop_ref: (B+1, TN) f32   -- resident across k (the reduction axis)
    """
    @pl.when(pl.program_id(1) == 0)
    def _init():
        prop_ref[...] = jnp.zeros_like(prop_ref)

    prop_ref[...] += jnp.dot(
        pc_ref[...], adj_ref[...], preferred_element_type=jnp.float32
    )


def _epilogue_kernel(pc_ref, prop_ref, out_ref):
    """Cheap O(B*V) epilogue: normalization, isolation score, log1p-mean."""
    batch = pc_ref.shape[0]
    pc = pc_ref[...]                       # (B, V) f32
    pnc = 1.0 - pc
    prop_all = prop_ref[...]               # (B+1, V) f32
    prop_c = prop_all[:batch]              # (B, V)
    deg = prop_all[batch:batch + 1]        # (1, V): ones @ A == row sums (A symmetric)
    # (1 - pc) @ A == deg - pc @ A  -> no second matmul.
    prop_nc = deg - prop_c

    norm_c = prop_c / (jnp.max(prop_c, axis=1, keepdims=True) + 1e-6)
    norm_nc = prop_nc / (jnp.max(prop_nc, axis=1, keepdims=True) + 1e-6)

    iso = (jnp.sum(jnp.abs(pc - norm_c), axis=1, keepdims=True)
           + jnp.sum(jnp.abs(pnc - norm_nc), axis=1, keepdims=True))      # (B, 1)
    total = (jnp.sum(prop_c, axis=1, keepdims=True)
             + jnp.sum(prop_nc, axis=1, keepdims=True))                   # (B, 1)
    penalty = iso / (total + 0.001)
    out_ref[0, 0] = jnp.mean(jnp.log1p(penalty))


def smooth_reg_loss(pred: jnp.ndarray, faces: jnp.ndarray, *, tn=None, tk=None):
    """pred: (B, V) float, faces: (F, 3) int. Returns scalar loss (float32)."""
    batch, num_verts = pred.shape
    assert num_verts % 128 == 0, "num_verts must be a multiple of 128"

    # Bigger tiles than before (tn >= tk) to amortize the ~0.35 us per-step
    # overhead on fast-HBM parts; bf16 keeps even 2048x1024 tiles at 4 MiB.
    tn = _pick_tile(num_verts, 2048) if tn is None else tn
    tk = _pick_tile(num_verts, 1024) if tk is None else tk
    assert num_verts % tn == 0 and num_verts % tk == 0
    assert tn % 128 == 0 and tk % 128 == 0

    # Hoist the sigmoid out of the kernel. f32 copy feeds the epilogue; the
    # matmul LHS is bf16 (native MXU path) with an extra all-ones row so the
    # degree vector falls out of the same matmul.
    pc32 = jax.nn.sigmoid(pred.astype(jnp.float32))                  # (B, V)
    ones_row = jnp.ones((1, num_verts), jnp.float32)
    pc_lhs = jnp.concatenate([pc32, ones_row], axis=0).astype(jnp.bfloat16)  # (B+1, V)

    adj = build_adjacency_matrix(num_verts, faces).astype(jnp.bfloat16)

    n_j, n_k = num_verts // tn, num_verts // tk

    # Scoped-VMEM budget from the chosen tiles (all operands double-buffered),
    # clamped to >= the default scoped limit and <= ~3/4 of physical VMEM
    # (generation-aware: ~48 MiB on v7x, ~96 MiB on v5e/v6e).
    vmem_need = (
        2 * tk * tn * 2                   # adjacency tiles (bf16, double-buffered)
        + 2 * (batch + 1 + 15) * tk * 2   # pc_lhs tiles (bf16, sublane-padded)
        + 2 * (batch + 1 + 7) * tn * 4    # prop output blocks (f32, sublane-padded)
        + (2 << 20)                       # headroom (internal scratch, padding)
    )
    vmem_limit = int(min(max(vmem_need, 16 << 20), _vmem_cap_bytes()))

    # TODO(synk): on v7x verify the j axis actually shards across both
    # TensorCores; if not, switch to pltpu.CORE_PARALLEL / pl.core_map.
    prop = pl.pallas_call(
        _propagate_kernel,
        out_shape=jax.ShapeDtypeStruct((batch + 1, num_verts), jnp.float32),
        grid_spec=pl.GridSpec(
            grid=(n_j, n_k),  # j = output-column tiles, k = contraction (last)
            in_specs=[
                pl.BlockSpec((batch + 1, tk), lambda j, k: (0, k)),  # pc_lhs chunk
                pl.BlockSpec((tk, tn), lambda j, k: (k, j)),         # adj streamed
            ],
            out_specs=pl.BlockSpec((batch + 1, tn), lambda j, k: (0, j)),
        ),
        compiler_params=pltpu.CompilerParams(
            dimension_semantics=("parallel", "arbitrary"),
            vmem_limit_bytes=vmem_limit,
        ),
    )(pc_lhs, adj)

    out = pl.pallas_call(
        _epilogue_kernel,
        out_shape=jax.ShapeDtypeStruct((1, 1), jnp.float32),
        grid_spec=pl.GridSpec(
            grid=(1,),
            in_specs=[
                pl.BlockSpec((batch, num_verts), lambda i: (0, 0)),
                pl.BlockSpec((batch + 1, num_verts), lambda i: (0, 0)),
            ],
            out_specs=pl.BlockSpec((1, 1), lambda i: (0, 0)),
        ),
        compiler_params=pltpu.CompilerParams(dimension_semantics=("arbitrary",)),
    )(pc32, prop)

    return out[0, 0]


def _reference(pred, faces):
    """Pure-JAX f32 reference mirroring the PyTorch forward."""
    adj = build_adjacency_matrix(pred.shape[1], faces)
    pc = jax.nn.sigmoid(pred.astype(jnp.float32))
    pnc = 1.0 - pc
    prop_c = pc @ adj.T
    prop_nc = pnc @ adj.T
    n_c = prop_c / (prop_c.max(axis=1, keepdims=True) + 1e-6)
    n_nc = prop_nc / (prop_nc.max(axis=1, keepdims=True) + 1e-6)
    iso = jnp.abs(pc - n_c).sum(axis=1) + jnp.abs(pnc - n_nc).sum(axis=1)
    norm = prop_c.sum(axis=1) + prop_nc.sum(axis=1) + 0.001
    return jnp.mean(jnp.log1p(iso / norm))


if __name__ == "__main__":
    B, V, F = 2, 512, 256  # small shapes: batch=2, 512 vertices, 256 faces
    key = jax.random.PRNGKey(0)
    k_pred, k_faces = jax.random.split(key)
    pred = jax.random.normal(k_pred, (B, V), dtype=jnp.float32)
    faces = jax.random.randint(k_faces, (F, 3), 0, V, dtype=jnp.int32)

    # tn=tk=128 -> a real 4x4 (column, contraction) grid even at this small V.
    loss = jax.block_until_ready(smooth_reg_loss(pred, faces, tn=128, tk=128))
    ref = jax.block_until_ready(_reference(pred, faces))
    # Tolerance loosened vs the f32 reference: the matmul LHS runs in bf16 on
    # the native MXU path (~3 decimal digits on sigmoid values).
    assert jnp.allclose(loss, ref, rtol=5e-3, atol=1e-3), (loss, ref)

    print("KERNEL_OK")
</pallas_src>

<mosaic_0001>
module attributes {stable_mosaic.version = 11 : i64} {
  func.func @_propagate_kernel(%arg0: i32, %arg1: i32, %arg2: memref<3x128xbf16, #tpu.memory_space<vmem>>, %arg3: memref<128x128xbf16, #tpu.memory_space<vmem>>, %arg4: memref<3x128xf32, #tpu.memory_space<vmem>>) attributes {dimension_semantics = [#tpu.dimension_semantics<parallel>, #tpu.dimension_semantics<arbitrary>], iteration_bounds = array<i64: 4, 4>, scalar_prefetch = 0 : i64, scratch_operands = 0 : i64, tpu.core_type = #tpu.core_type<tc>, window_params = [{transform_indices = @transform_0, window_bounds = array<i64: 3, 128>}, {transform_indices = @transform_1, window_bounds = array<i64: 128, 128>}, {transform_indices = @transform_2, window_bounds = array<i64: 3, 128>}]} {
    %c0_i32 = arith.constant 0 : i32
    %0 = arith.cmpi eq, %arg1, %c0_i32 : i32
    %1 = arith.extui %0 : i1 to i32
    %c0_i32_0 = arith.constant 0 : i32
    %2 = arith.cmpi ne, %1, %c0_i32_0 : i32
    scf.if %2 {
      %cst_8 = arith.constant 0.000000e+00 : f32
      %9 = vector.broadcast %cst_8 : f32 to vector<3x128xf32>
      %c0_9 = arith.constant 0 : index
      %c0_10 = arith.constant 0 : index
      %10 = vector.load %arg4[%c0_9, %c0_10] : memref<3x128xf32, #tpu.memory_space<vmem>>, vector<3x128xf32>
      tpu.vector_store %arg4[%c0_9, %c0_10], %9 {strides = array<i32>} : memref<3x128xf32, #tpu.memory_space<vmem>>, vector<3x128xf32>,
    } else {
    }
    %c0 = arith.constant 0 : index
    %c0_1 = arith.constant 0 : index
    %3 = vector.load %arg4[%c0, %c0_1] : memref<3x128xf32, #tpu.memory_space<vmem>>, vector<3x128xf32>
    %c0_2 = arith.constant 0 : index
    %c0_3 = arith.constant 0 : index
    %4 = vector.load %arg2[%c0_2, %c0_3] : memref<3x128xbf16, #tpu.memory_space<vmem>>, vector<3x128xbf16>
    %c0_4 = arith.constant 0 : index
    %c0_5 = arith.constant 0 : index
    %5 = vector.load %arg3[%c0_4, %c0_5] : memref<128x128xbf16, #tpu.memory_space<vmem>>, vector<128x128xbf16>
    %cst = arith.constant dense<0.000000e+00> : vector<3x128xf32>
    %6 = tpu.matmul %4, %5, %cst {dimension_numbers = #tpu.dot_dimension_numbers<[1], [0], [0], [1], [0, 0, 1, 1], [], []>} : vector<3x128xbf16>, vector<128x128xbf16>, vector<3x128xf32> -> vector<3x128xf32>
    %7 = arith.addf %3, %6 : vector<3x128xf32>
    %c0_6 = arith.constant 0 : index
    %c0_7 = arith.constant 0 : index
    %8 = vector.load %arg4[%c0_6, %c0_7] : memref<3x128xf32, #tpu.memory_space<vmem>>, vector<3x128xf32>
    tpu.vector_store %arg4[%c0_6, %c0_7], %7 {strides = array<i32>} : memref<3x128xf32, #tpu.memory_space<vmem>>, vector<3x128xf32>,
    return
  }
  func.func @transform_0(%arg0: i32, %arg1: i32) -> (i32, i32) {
    %c0_i32 = arith.constant 0 : i32
    %c0_i32_0 = arith.constant 0 : i32
    return %c0_i32, %arg1 : i32, i32
  }
  func.func @transform_1(%arg0: i32, %arg1: i32) -> (i32, i32) {
    %c0_i32 = arith.constant 0 : i32
    return %arg1, %arg0 : i32, i32
  }
  func.func @transform_2(%arg0: i32, %arg1: i32) -> (i32, i32) {
    %c0_i32 = arith.constant 0 : i32
    %c0_i32_0 = arith.constant 0 : i32
    return %c0_i32, %arg0 : i32, i32
  }
}

</mosaic_0001>

<bundles_post_ra>
// kernel: tpu_custom_call.1
= control target key start
LH: loop header
LB: loop body
LE: loop exit
PB: predicated region body
PF: predicated region fallthrough
CT: control target
= control target key end

     0   :  { %s1250_s0 = inlined_call_operand.hbm [shape: bf16[3,512], index: 0, kind: input, shape index: {}]   ;;  %s1251_s1 = inlined_call_operand.hbm [shape: bf16[512,512], index: 1, kind: input, shape index: {}]   ;;  %s1252_s2 = inlined_call_operand.hbm [shape: f32[3,512], index: 2, kind: output, shape index: {}]  }
   0x1   :  { %1260 = sst [smem:[#allocation17_spill]] %s1250_s0 }
   0x2   :  { %7 = vsyncpa [#allocation3], 0 }
   0x3   :  { %9 = vsyncpa [#allocation3 + $0x1], 0 }
   0x4   :  { %10 = vsyncpa [#allocation6], 0 }
   0x5   :  { %12 = vsyncpa [#allocation6 + $0x1], 0 }
   0x6   :  { %13 = vsyncpa [#allocation4], 0 }
   0x7   :  { %15 = vsyncpa [#allocation4 + $0x1], 0  ;;  %s888_s9 = smov 0   ;;  %s890_s10 = smov 0  }
   0x8   :  { %s892_s11 = smov 0   ;;  %s894_s12 = smov 0  }
   0x9   :  { %s896_s13 = smov 0   ;;  %s898_s14 = smov 0  }
   0xa   :  { %s900_s15 = smov 0   ;;  %s902_s16 = smov 0  }
   0xb   :  { %s904_s17 = smov 0   ;;  %s906_s18 = smov 0  }
   0xc   :  { %s908_s19 = smov 0   ;;  %s910_s20 = smov 0  }
   0xd   :  { %s912_s21 = smov 0   ;;  %s914_s22 = smov 0  }
   0xe LB: > { %1261 = sst [smem:[#allocation11_spill]] %s842_s17  ;;  %s450_s23 = sadd.s32 4294967295, %s862_s22   ;;  %s862_s22 = sphi %s914_s22, %s21_s22   ;;  %s858_s21 = sphi %s912_s21, %s1290_s21   ;;  %s854_s20 = sphi %s910_s20, %s1301_s20   ;;  %s850_s19 = sphi %s908_s19, %s1288_s19   ;;  %s846_s18 = sphi %s906_s18, %s1300_s18   ;;  %s842_s17 = sphi %s904_s17, %s1287_s17   ;;  %s838_s16 = sphi %s902_s16, %s1299_s16   ;;  %s834_s15 = sphi %s900_s15, %s1298_s15   ;;  %s830_s14 = sphi %s898_s14, %s1297_s14   ;;  %s826_s13 = sphi %s896_s13, %s1296_s13   ;;  %s822_s12 = sphi %s894_s12, %s1295_s12   ;;  %s818_s11 = sphi %s892_s11, %s1294_s11   ;;  %s814_s10 = sphi %s890_s10, %s1293_s10   ;;  %s810_s9 = sphi %s888_s9, %s1292_s9  }
   0xf   : > { %1262 = sst [smem:[#allocation12_spill]] %s858_s21  ;;  %s451_s24 = sadd.s32 4294967294, %s862_s22  }
  0x10   : > { %s30_s25 = sadd.s32 1, %s854_s20  ;;  %s33_s26 = sadd.s32 1, %s858_s21 }
  0x11   : > { %p31_p0 = scmp.ge.s32.totalorder %s30_s25, 4  ;;  %s40_s27 = sadd.s32 1, %s842_s17 }
  0x12   : > { %p47_p1 = scmp.ne.s32.totalorder %s842_s17, %s838_s16  ;;  %p48_p2 = scmp.eq.s32.totalorder %s862_s22, 0 }
  0x13   : > { %s1303_s25 = smov (%p31_p0, %s30_s25), 0  ;;  %s1305_s26 = smov (!%p31_p0, %s33_s26), %s858_s21 }
  0x14   : > { %1263 = sst [smem:[#allocation13_spill]] %s1303_s25  ;;  %s37_s28 = ssub.s32 %s854_s20, %s1303_s25 }
  0x15   : > { %p971_p3 = por %p48_p2, %p47_p1  ;;  %p35_p4 = scmp.ge.s32.totalorder %s1305_s26, 4 }
  0x16   : > { %p38_p5 = scmp.eq.s32.totalorder %s37_s28, 0  ;;  %p53_p6 = scmp.ne.s32.totalorder %s838_s16, %s834_s15 }
  0x17   : > { %p978_p7 = scmp.eq.s32.totalorder %s450_s23, 0  ;;  %s1307_s26 = smov (%p35_p4, %s1305_s26), 0 }
  0x18   : > { %1266 = sst [smem:[#allocation14_spill]] %s1307_s26  ;;  %s64_s5 = ssub.s32 %s858_s21, %s1307_s26 }
  0x19   : > { %s985_s3 = scalar_select %p38_p5, %s842_s17, %s40_s27  }
  0x1a   : > { %p989_p8 = por %p978_p7, %p53_p6  ;;  %s65_s6 = sor.u32 %s64_s5, %s37_s28 }
  0x1b   : > { %1267 = sst [smem:[#allocation15_spill]] %s985_s3  ;;  %s68_s7 = sadd.s32 1, %s830_s14 }
  0x1c   : > { %s1268_s4 = scalar_select %p989_p8, 1, 0 }
  0x1d   : > { %p66_p9 = scmp.eq.s32.totalorder %s65_s6, 0  ;;  %p75_p10 = scmp.ne.s32.totalorder %s830_s14, %s826_s13 }
  0x1e   : > { %p81_p11 = scmp.ne.s32.totalorder %s826_s13, %s822_s12  ;;  %p92_p12 = scmp.eq.s32.totalorder %s64_s5, 0 }
  0x1f   : > { %s1001_s8 = scalar_select %p66_p9, %s830_s14, %s68_s7  }
  0x20   : > { %p1005_p13 = por %p75_p10, %p48_p2  ;;  %p1011_p0 = por %p81_p11, %p978_p7 }
  0x21   : > { %1269 = sst [smem:[#allocation16_spill]] %s1001_s8  ;;  %s94_s28 = sadd.s32 1, %s818_s11 }
  0x22   : > { %s1271_s27 = scalar_select %p1011_p0, 1, 0 }
  0x23   : > { %p104_p1 = scmp.ne.s32.totalorder %s818_s11, %s814_s10  ;;  %p105_p4 = scmp.eq.s32.totalorder %s450_s23, 15 }
  0x24   : > { %s1019_s6 = scalar_select %p92_p12, %s818_s11, %s94_s28  }
  0x25   : > { %p110_p5 = scmp.ne.s32.totalorder %s814_s10, %s810_s9  ;;  %p111_p2 = scmp.eq.s32.totalorder %s451_s24, 15 }
  0x26   : > { %p1027_p6 = por %p105_p4, %p104_p1  ;;  %p524_p7 = scmp.lt.s32.totalorder %s862_s22, 16 }
  0x27   : > { %p1032_p9 = por %p111_p2, %p110_p5  ;;  %s131_s5 = sand.u32 1, %s842_s17  }
  0x28   : > { %s1272_s12 = scalar_select %p1027_p6, 1, 0 }
  0x29   : > { %s1273_s30 = scalar_select %p1032_p9, 1, 0 }
  0x2a   : > { %s454_s7 = sshll.u32 %s131_s5, 1  ;;  %s455_s28 = sshll.u32 %s854_s20, 5 }
  0x2b   : > { %s1274_s0 = sld [smem:[#allocation17_spill]]  ;;  %s135_s24 = scalar_lea.vmem [#allocation2], %s454_s7 }
  0x2c   : > { %s142_s3 = sshll.u32 %s135_s24, 4  ;;  %p1047_p10 = pnand %p524_p7, %p971_p3  ;;  %s1043_s3 = int_to_ptr.vmem [resolvable:$true] %s142_s3 }
  0x2d   : > { %p1054_p11 = pnand %p524_p7, %p1005_p13  ;;  %s132_s26 = scalar_lea.sflag [#allocation3], %s131_s5 }
  0x2e   : > { %p654_p4 = pneg %p1047_p10 }
  0x31   : > { %s1041_s23 = scalar_lea.hbm %s1274_s0, %s455_s28  ;;  %s657_s24 = scalar_lea.hbm %s1274_s0, 128 }
  0x32   : > { %s652_s7 = scalar_lea.hbm %s1041_s23, 32  ;;  %p658_p13 = scmp.lt.u32.totalorder %s1041_s23, %s1274_s0 }
  0x33   : > { %p653_p1 = scmp.ne.s32.totalorder %s1041_s23, %s652_s7  ;;  %p659_p2 = scmp.lt.u32.totalorder %s657_s24, %s652_s7 }
  0x34   : > { %p661_p12 = scmp.lt.u32.totalorder %s652_s7, %s1041_s23 }
  0x35   : > { %p655_p3 = pnand %p654_p4, %p653_p1  ;;  %p660_p7 = por %p659_p2, %p658_p13 }
  0x37   : > { %p656_p5 = pneg %p655_p3  ;;  %p662_p9 = por %p661_p12, %p660_p7 }
  0x39   : > { %p663_p6 = pnand %p662_p9, %p656_p5 }
  0x3b   : > { %666 = shalt.err (!%p663_p6)
}
  0x3c   : > { %s667_s5 = scalar_lea.vmem %s1043_s3, 32  ;;  %s864_s29 = smov [#allocation2]  }
  0x3d   : > { %p668_p1 = scmp.ne.s32.totalorder %s1043_s3, %s667_s5  ;;  %s672_s28 = sshll.u32 %s864_s29, 4  ;;  %s673_s28 = int_to_ptr.vmem [resolvable:$false] %s672_s28 }
  0x3e   : > { %s674_s17 = scalar_lea.vmem %s673_s28, 64  ;;  %p675_p8 = scmp.lt.s32.totalorder %s1043_s3, %s673_s28 }
  0x3f   : > { %p670_p3 = pnand %p668_p1, %p654_p4  ;;  %p676_p13 = scmp.lt.s32.totalorder %s674_s17, %s667_s5 }
  0x41   : > { %p671_p0 = pneg %p670_p3  ;;  %p677_p2 = por %p676_p13, %p675_p8 }
  0x43   : > { %p678_p12 = pnand %p677_p2, %p671_p0 }
  0x45   : > { %681 = shalt.err (!%p678_p12)
}
  0x46   : > { %516 = dma.hbm_to_vmem [thread:$0]  (!%p1047_p10), %s1041_s23, 32, %s1043_s3, %s132_s26  }
  0x47   : > { %p170_p6 = scmp.lt.s32.totalorder %s862_s22, 17  ;;  %s149_s7 = sand.u32 1, %s830_s14  }
  0x48   : > { %s1277_s24 = sshll.u32 %s854_s20, 6  ;;  %p1278_p9 = scmp.ge.s32.totalorder %s862_s22, 1 }
  0x49   : > { %s159_s15 = sadd.s32 %s858_s21, %s1277_s24  ;;  %s456_s8 = sshll.u32 %s149_s7, 6 }
  0x4a   : > { %p1091_p8 = pnand %p1278_p9, %p170_p6  ;;  %s459_s29 = sshll.u32 %s159_s15, 6 }
  0x4b   : > { %s1098_s0 = scalar_lea.hbm %s1251_s1, %s459_s29  ;;  %s153_s3 = scalar_lea.vmem [#allocation5], %s456_s8 }
  0x4c   : > { %s162_s23 = sshll.u32 %s153_s3, 4  ;;  %s1102_s26 = scalar_lea.sflag [#allocation6], %s149_s7  ;;  %s1100_s23 = int_to_ptr.vmem [resolvable:$true] %s162_s23 }
  0x4d   : > { %s682_s24 = scalar_lea.hbm %s1098_s0, 1024  ;;  %p684_p10 = pneg %p1054_p11 }
  0x4e   : > { %p683_p0 = scmp.ne.s32.totalorder %s1098_s0, %s682_s24  ;;  %s687_s28 = scalar_lea.hbm %s1251_s1, 16384 }
  0x4f   : > { %p688_p7 = scmp.lt.u32.totalorder %s1098_s0, %s1251_s1  ;;  %p689_p1 = scmp.lt.u32.totalorder %s687_s28, %s682_s24 }
  0x50   : > { %p685_p4 = pnand %p684_p10, %p683_p0  ;;  %p691_p13 = scmp.lt.u32.totalorder %s682_s24, %s1098_s0 }
  0x51   : > { %p690_p3 = por %p689_p1, %p688_p7 }
  0x52   : > { %p686_p5 = pneg %p685_p4 }
  0x53   : > { %p692_p2 = por %p691_p13, %p690_p3 }
  0x55   : > { %p693_p12 = pnand %p692_p2, %p686_p5 }
  0x57   : > { %696 = shalt.err (!%p693_p12)
}
  0x58   : > { %s697_s7 = scalar_lea.vmem %s1100_s23, 1024  ;;  %s865_s8 = smov [#allocation5]  }
  0x59   : > { %p698_p6 = scmp.ne.s32.totalorder %s1100_s23, %s697_s7  ;;  %s702_s3 = sshll.u32 %s865_s8, 4  ;;  %s703_s3 = int_to_ptr.vmem [resolvable:$false] %s702_s3 }
  0x5a   : > { %s704_s21 = scalar_lea.vmem %s703_s3, 2048  ;;  %p705_p4 = scmp.lt.s32.totalorder %s1100_s23, %s703_s3 }
  0x5b   : > { %p700_p9 = pnand %p698_p6, %p684_p10  ;;  %p706_p7 = scmp.lt.s32.totalorder %s704_s21, %s697_s7 }
  0x5d   : > { %p701_p0 = pneg %p700_p9  ;;  %p707_p1 = por %p706_p7, %p705_p4 }
  0x5f   : > { %p708_p3 = pnand %p707_p1, %p701_p0 }
  0x61   : > { %711 = shalt.err (!%p708_p3)
}
  0x62   : > { %s866_s24 = smov 256   ;;  %s867_s15 = smov 64  }
  0x63   : > { %s868_s29 = smov 4   ;;  %174 = sbr.rel (%p1091_p8) target bundleno = 381 (0x17d), region = 28 }
  0x64   : > { %519 = dma.hbm_to_vmem [thread:$0]  (!%p1054_p11), %s1098_s0, 1024, %s1100_s23, %s1102_s26, %s866_s24, %s867_s15, %s868_s29  }
  0x65   : > { %s176_s28 = sand.u32 (!%p1091_p8), 1, %s838_s16   ;;  %p1280_p10 = scmp.ne.s32.totalorder (!%p1091_p8), %s1268_s4, 0 }
  0x66   : > { %s1133_s17 = sshll.u32 (!%p1091_p8), %s176_s28, 1  ;;  %s177_s7 = scalar_lea.sflag (!%p1091_p8), [#allocation3], %s176_s28 }
  0x67   : > { %s180_s8 = scalar_lea.vmem (!%p1091_p8), [#allocation2], %s1133_s17 }
  0x6a   : > { %797 = dma.done.wait (%p1280_p10), %s177_s7, 32  }
  0x6b   : > { %799 = vsyncadd (%p1280_p10), %s177_s7, 4294967264  ;;  %s185_s25 = sand.u32 1, %s826_s13   ;;  %p1281_p11 = scmp.ne.s32.totalorder %s1271_s27, 0 }
  0x6c   : > { %s462_s0 = sshll.u32 %s185_s25, 6  ;;  %s186_s23 = scalar_lea.sflag [#allocation6], %s185_s25 }
  0x6d   : > { %s1141_s5 = scalar_lea.vmem [#allocation5], %s462_s0 }
  0x6e   : > { %801 = dma.done.wait (%p1281_p11), %s186_s23, 1024  }
  0x6f   : > { %803 = vsyncadd (%p1281_p11), %s186_s23, 4294966272  ;;  %s212_s26 = sand.u32 1, %s814_s10   ;;  %p464_p8 = scmp.ne.s32.totalorder %s846_s18, 0 }
  0x70   : > { %s463_s3 = sshll.u32 %s212_s26, 2  ;;  %v869_v0 = vmov (!%p464_p8), 0.0  }
  0x71   : > { %s1150_s21 = scalar_lea.vmem [#allocation7], %s463_s3  ;;  %220 = sbr.rel (%p464_p8) target bundleno = 120 (0x78), region = 40 }
  0x72   : > { %221 = vst [vmem:[%s1150_s21] sm:$0x7] (!%p464_p8), %v869_v0 }
  0x78 PF: > { %v644_v1 = vld [vmem:[%s1141_s5] sm:$0xff]   ;;  %v870_v2 = vmov 0.0   ;;  %v645_v3 = vld [vmem:[%s1141_s5 + $0x8] sm:$0xff]   ;;  %vm871_vm0 = vmmov 0   ;;  %v646_v4 = vld [vmem:[%s1141_s5 + $0x10] sm:$0xff]   ;;  %s474_s18 = sshll.u32 %s850_s19, 6 }
  0x79   : > { %487 = vmatprep.subr.bf16.mxu0 %v870_v2  ;;  %503 = vmatprep.mubr.msk.bf16.mxu0 %vm871_vm0, %v870_v2  ;;  %v647_v5 = vld [vmem:[%s1141_s5 + $0x18] sm:$0xff]   ;;  %v648_v6 = vld [vmem:[%s1141_s5 + $0x20] sm:$0xff]   ;;  %v649_v7 = vld [vmem:[%s1141_s5 + $0x28] sm:$0xff]   ;;  %s344_s4 = sshll.u32 %s1150_s21, 4  ;;  %s1170_s15 = scalar_lea.hbm %s1252_s2, %s474_s18  ;;  %s1172_s4 = int_to_ptr.vmem [resolvable:$true] %s344_s4 }
  0x7a   : > { %488 = vmatpush3.bf16.msra.mxu0 %v644_v1  ;;  %v650_v8 = vld [vmem:[%s1141_s5 + $0x30] sm:$0xff]   ;;  %v651_v9 = vld [vmem:[%s1141_s5 + $0x38] sm:$0xff]   ;;  %v222_v11 = vld [vmem:[%s1150_s21] sm:$0x7]  ;;  %s331_s29 = scalar_lea.sflag [#allocation4], %s212_s26  ;;  %s712_s19 = scalar_lea.vmem %s1172_s4, 64 }
  0x7b   : > { %489 = vmatprep.subr.bf16.mxu0 %v870_v2  ;;  %v223_v10 = vld [vmem:[%s180_s8] sm:$0x3]  ;;  %p713_p5 = scmp.ne.s32.totalorder %s1172_s4, %s712_s19  ;;  %p1282_p13 = scmp.ne.s32.totalorder %s1272_s12, 0 }
  0x7c   : > { %s872_s28 = smov [#allocation7]  }
  0x7d   : > { %p714_p2 = pnand %p713_p5, %p1282_p13  ;;  %s716_s17 = sshll.u32 %s872_s28, 4  ;;  %s717_s17 = int_to_ptr.vmem [resolvable:$false] %s716_s17 }
  0x7e   : > { %490 = vmatpush3.bf16.msra.mxu0 %v645_v3  ;;  %s718_s7 = scalar_lea.vmem %s717_s17, 128  ;;  %p719_p6 = scmp.lt.s32.totalorder %s1172_s4, %s717_s17 }
  0x7f   : > { %491 = vmatprep.subr.bf16.mxu0 %v870_v2  ;;  %p715_p12 = pneg %p714_p2  ;;  %p720_p9 = scmp.lt.s32.totalorder %s718_s7, %s712_s19 }
  0x81   : > { %p721_p0 = por %p720_p9, %p719_p6 }
  0x82   : > { %492 = vmatpush3.bf16.msra.mxu0 %v646_v4 }
  0x83   : > { %493 = vmatprep.subr.bf16.mxu0 %v870_v2  ;;  %p722_p4 = pnand %p721_p0, %p715_p12 }
  0x86   : > { %494 = vmatpush3.bf16.msra.mxu0 %v647_v5 }
  0x87   : > { %495 = vmatprep.subr.bf16.mxu0 %v870_v2 }
  0x8a   : > { %496 = vmatpush3.bf16.msra.mxu0 %v648_v6 }
  0x8b   : > { %497 = vmatprep.subr.bf16.mxu0 %v870_v2 }
  0x8e   : > { %498 = vmatpush3.bf16.msra.mxu0 %v649_v7 }
  0x8f   : > { %499 = vmatprep.subr.bf16.mxu0 %v870_v2 }
  0x92   : > { %500 = vmatpush3.bf16.msra.mxu0 %v650_v8 }
  0x93   : > { %501 = vmatprep.subr.bf16.mxu0 %v870_v2 }
  0x96   : > { %502 = vmatpush3.bf16.msra.mxu0 %v651_v9 }
  0x99   : > { %504 = vmatmul.mubr.bf16.vlgmr.msra.gmra.mrb[0].mxu0 %v223_v10 }
 0x16c   : > { %v322_v12 = vpop.f32.mrb[0].mxu0 }
 0x16d   : > { %v328_v13 = vadd.f32 %v322_v12, %v222_v11  ;;  %v505_v14 = vpop.f32.mrb[1].mxu0 }
 0x16e   : > { %v325_v15 = vpop.f32.mrb[2].mxu0 }
 0x16f   : > { %329 = vst [vmem:[%s1150_s21] sm:$0x7] %v328_v13  ;;  %v506_v16 = vpop.f32.mrb[3].mxu0 }
 0x170   : > { %725 = shalt.err (!%p722_p4)
}
 0x171   : > { %s726_s8 = scalar_lea.hbm %s1170_s15, 64  ;;  %s730_s23 = scalar_lea.hbm %s1252_s2, 256 }
 0x172   : > { %p727_p7 = scmp.ne.s32.totalorder %s1170_s15, %s726_s8  ;;  %p731_p10 = scmp.lt.u32.totalorder %s1170_s15, %s1252_s2 }
 0x173   : > { %p732_p11 = scmp.lt.u32.totalorder %s730_s23, %s726_s8  ;;  %p734_p5 = scmp.lt.u32.totalorder %s726_s8, %s1170_s15 }
 0x174   : > { %p728_p1 = pnand %p727_p7, %p1282_p13 }
 0x175   : > { %p733_p8 = por %p732_p11, %p731_p10 }
 0x176   : > { %p729_p3 = pneg %p728_p1 }
 0x177   : > { %p735_p2 = por %p734_p5, %p733_p8 }
 0x179   : > { %p736_p12 = pnand %p735_p2, %p729_p3 }
 0x17b   : > { %739 = shalt.err (!%p736_p12)
}
 0x17c   : > { %511 = dma.vmem_to_hbm [thread:$0]  (%p1282_p13), %s1172_s4, 64, %s1170_s15, %s331_s29  }
 0x17d PF: > { %p525_p6 = scmp.ge.s32.totalorder %s862_s22, 2  ;;  %s356_s3 = sand.u32 1, %s810_s9  }
 0x17e   : > { %p1283_p9 = scmp.ne.s32.totalorder %s1273_s30, 0  ;;  %s357_s21 = scalar_lea.sflag [#allocation4], %s356_s3 }
 0x180   : > { %p521_p0 = pnand %p525_p6, %p1283_p9 }
 0x182   : > { %805 = dma.done.wait (!%p521_p0), %s357_s21, 64  }
 0x183   : > { %807 = vsyncadd (!%p521_p0), %s357_s21, 4294967232  ;;  %s21_s22 = sadd.s32 1, %s862_s22   ;;  %s1285_s4 = sld [smem:[#allocation16_spill]] }
 0x184   : > { %p1203_p4 = scmp.ge.s32.totalorder %s21_s22, 18   ;;  %s1286_s27 = sld [smem:[#allocation11_spill]] }
 0x185   : > { %s1287_s17 = sld [smem:[#allocation15_spill]]  ;;  %s1288_s19 = sld [smem:[#allocation12_spill]] }
 0x186   : > { %s1289_s30 = sld [smem:[#allocation13_spill]]  ;;  %s1290_s21 = sld [smem:[#allocation14_spill]] }
 0x187   : > { %s1292_s9 = smov %s814_s10  ;;  %s1293_s10 = smov %s818_s11 }
 0x188   : > { %s1294_s11 = smov %s1019_s6  ;;  %s1295_s12 = smov %s826_s13 }
 0x189   : > { %s1296_s13 = smov %s830_s14  ;;  %s1297_s14 = smov %s1285_s4 }
 0x18a   : > { %s1298_s15 = smov %s838_s16  ;;  %s1299_s16 = smov %s1286_s27 }
 0x18b   : > { %s1300_s18 = smov %s854_s20  ;;  %20 = sbr.rel (!%p1203_p4) target bundleno = 14 (0xe), region = 90 }
 0x18c   : > { %s1301_s20 = smov %s1289_s30 }
 0x192   :  { %362 = vsyncpa [#allocation3], 1 }
 0x193   :  { %364 = vsyncpa [#allocation3 + $0x1], 1 }
 0x194   :  { %365 = vsyncpa [#allocation6], 1 }
 0x195   :  { %367 = vsyncpa [#allocation6 + $0x1], 1 }
 0x196   :  { %368 = vsyncpa [#allocation4], 1 }
 0x197   :  { %370 = vsyncpa [#allocation4 + $0x1], 1 }

</bundles_post_ra>
